<compile_context>
chip_gen: v7x
topology: tpu7x:2x2x1
jax: 0.10.0
libtpu: 0.0.40
codegen_flags: <defaults>
</compile_context>

<pallas_src>
import numpy as np
import jax
import jax.numpy as jnp
from jax.experimental import pallas as pl
from jax.experimental.pallas import tpu as pltpu

ANCESTOR_INDEX = [[], [0], [0], [0], [0, 1], [0, 2], [0, 3], [0, 1, 4], [0, 2, 5],
                  [0, 3, 6], [0, 1, 4, 7], [0, 2, 5, 8], [0, 3, 6, 9], [0, 3, 6, 9],
                  [0, 3, 6, 9], [0, 3, 6, 9, 12], [0, 3, 6, 9, 13], [0, 3, 6, 9, 14],
                  [0, 3, 6, 9, 13, 16], [0, 3, 6, 9, 14, 17], [0, 3, 6, 9, 13, 16, 18],
                  [0, 3, 6, 9, 14, 17, 19], [0, 3, 6, 9, 13, 16, 18, 20],
                  [0, 3, 6, 9, 14, 17, 19, 21]]

Joint3D_INDEX = [[17], [17, 11], [17, 12], [17], [17, 11, 13], [17, 12, 14], [17],
                 [17, 11, 13, 15], [17, 12, 14, 16], [17, 5, 6, 18], [17, 11, 13, 15],
                 [17, 12, 14, 16], [17, 18], [17, 5], [17, 6], [18, 0, 1, 2, 3, 4],
                 [17, 5], [17, 6], [17, 5, 7], [17, 6, 8], [17, 5, 7, 9],
                 [17, 6, 8, 10], [17, 15, 7, 9], [17, 6, 8, 10]]

NUM_JOINTS = 24
NPOSE = 6
POSE_DIM = NUM_JOINTS * NPOSE  # 144


# ----------------------------------------------------------------------------
# Pallas kernel: out = x@Wx + e@We + g@Wg + bias, all folded weights, f32 acc.
# ----------------------------------------------------------------------------
def ktd_kernel(x_ref, e_ref, g_ref, wx_ref, we_ref, wg_ref, b_ref, o_ref):
    wx = wx_ref[...]
    we = we_ref[...]
    wg = wg_ref[...]
    cdt = wx.dtype  # compute dtype (bf16 prod / f32 verification)

    # .astype is a no-op when the caller already supplies activations in the
    # compute dtype (the preferred production contract); it is only a VPU
    # fallback for f32 inputs and never adds HBM traffic.
    acc = jnp.dot(x_ref[...].astype(cdt), wx, preferred_element_type=jnp.float32)
    acc = acc + jnp.dot(e_ref[...].astype(cdt), we, preferred_element_type=jnp.float32)
    acc = acc + jnp.dot(g_ref[...].astype(cdt), wg, preferred_element_type=jnp.float32)
    o_ref[...] = (acc + b_ref[...]).astype(o_ref.dtype)


def _round_up(v, m):
    return ((v + m - 1) // m) * m


def ktd_pallas(x, embed, gp, params, row_tile=512, out_dtype=jnp.float32,
               embed_buffers=2, min_grid_steps=4):
    """x: (B,T,H), embed: (B,T,J3,E), gp: (B,T,144) -> (B,T,144).

    Caller contract for best performance (mem-bound kernel, ~61 FLOP/byte):
      * Produce x / embed / gp in bf16 UPSTREAM (do not add a wrapper-side
        astype -- that costs an extra HBM read+write pass).  f32 inputs are
        accepted and cast in-VMEM as a fallback.
      * Set out_dtype=jnp.bfloat16 if downstream tolerates it (halves the
        output writeback stream).
    row_tile: 512 is a good default on v5e/v6e/v7x (fits every generation's
    default scoped VMEM double-buffered); the tile is additionally clamped so
    the grid keeps >= min_grid_steps steps (v7x has 2 TensorCores) but never
    below 128 rows on large inputs.
    """
    w_x, w_e, w_g, bias_eff = params
    B, T, H = x.shape
    J3, E = embed.shape[2], embed.shape[3]
    N = B * T
    KE = J3 * E

    # Pure reshapes (contiguous): no HBM round trip of a concatenated "base".
    x2d = x.reshape(N, H)
    e2d = embed.reshape(N, KE)
    g2d = gp.reshape(N, POSE_DIM)

    act_itemsize = jnp.dtype(x2d.dtype).itemsize
    out_itemsize = jnp.dtype(out_dtype).itemsize
    w_itemsize = jnp.dtype(w_x.dtype).itemsize

    # Row-tile granule: 16 for 16-bit activations (sublane packing), else 8.
    granule = 16 if act_itemsize == 2 else 8

    # Largest useful tile, then ensure enough grid steps for v7x's 2 TCs
    # (never shrinking below 128 rows just for step count on big inputs).
    tile = min(int(row_tile), _round_up(N, granule))
    steps_cap = _round_up(pl.cdiv(N, max(1, int(min_grid_steps))), granule)
    tile = max(granule, min(tile, max(steps_cap, 128)))
    grid = (pl.cdiv(N, tile),)

    # VMEM working-set estimate (double-buffered acts + resident weights).
    n_e_buf = max(2, int(embed_buffers))
    vmem_est = (2 * tile * (H + POSE_DIM) * act_itemsize
                + n_e_buf * tile * KE * act_itemsize
                + 2 * tile * POSE_DIM * out_itemsize
                + (H + KE + POSE_DIM) * POSE_DIM * w_itemsize
                + POSE_DIM * 4)
    vmem_limit = None
    if vmem_est > 14 * (1 << 20):  # beyond v5e's 16 MiB scoped default
        vmem_limit = int(min(vmem_est * 5 // 4 + (1 << 20), 56 * (1 << 20)))

    cp_kwargs = dict(dimension_semantics=("parallel",))
    if vmem_limit is not None:
        cp_kwargs["vmem_limit_bytes"] = vmem_limit

    # Optional deeper buffering on the widest input stream (embed ~75% of
    # input bytes).  Off by default; sweep only if DMA is exposed at small
    # tiles.
    if n_e_buf > 2:
        e_spec = pl.BlockSpec((tile, KE), lambda i: (i, 0),
                              pipeline_mode=pl.Buffered(n_e_buf))
    else:
        e_spec = pl.BlockSpec((tile, KE), lambda i: (i, 0))

    weight_bytes = (H + KE + POSE_DIM) * POSE_DIM * w_itemsize + POSE_DIM * 4
    cost = pl.CostEstimate(
        flops=2 * N * (H + KE + POSE_DIM) * POSE_DIM,
        transcendentals=0,
        bytes_accessed=(N * (H + KE + POSE_DIM) * act_itemsize
                        + N * POSE_DIM * out_itemsize
                        + weight_bytes),
    )

    out = pl.pallas_call(
        ktd_kernel,
        out_shape=jax.ShapeDtypeStruct((N, POSE_DIM), out_dtype),
        grid=grid,
        in_specs=[
            pl.BlockSpec((tile, H), lambda i: (i, 0)),
            e_spec,
            pl.BlockSpec((tile, POSE_DIM), lambda i: (i, 0)),
            # Weights / bias: constant block index -> stay VMEM-resident.
            pl.BlockSpec((H, POSE_DIM), lambda i: (0, 0)),
            pl.BlockSpec((KE, POSE_DIM), lambda i: (0, 0)),
            pl.BlockSpec((POSE_DIM, POSE_DIM), lambda i: (0, 0)),
            pl.BlockSpec((1, POSE_DIM), lambda i: (0, 0)),
        ],
        out_specs=pl.BlockSpec((tile, POSE_DIM), lambda i: (i, 0)),
        compiler_params=pltpu.CompilerParams(**cp_kwargs),
        cost_estimate=cost,
    )(x2d, e2d, g2d, w_x, w_e, w_g, bias_eff)

    return out.reshape(B, T, POSE_DIM)


# ----------------------------------------------------------------------------
# Deterministic parameter init (mirrors nn.Linear + xavier_uniform(gain=0.01)).
# ----------------------------------------------------------------------------
def init_params(key, hidden_dim, embed_dim):
    ws, bs = [], []
    for j in range(NUM_JOINTS):
        in_dim = (hidden_dim + embed_dim * len(Joint3D_INDEX[j])
                  + NPOSE * len(ANCESTOR_INDEX[j]) + 6)
        key, kw, kb = jax.random.split(key, 3)
        bound = 0.01 * float(np.sqrt(6.0 / (in_dim + NPOSE)))
        w = jax.random.uniform(kw, (NPOSE, in_dim), jnp.float32, -bound, bound)
        bb = 1.0 / float(np.sqrt(in_dim))
        b = jax.random.uniform(kb, (NPOSE,), jnp.float32, -bb, bb)
        ws.append(np.asarray(w))
        bs.append(np.asarray(b))
    return ws, bs


# ----------------------------------------------------------------------------
# Packing: scatter per-joint Linear weights into a fused layout and fold the
# kinematic recursion via the exact nilpotent inverse (I - L)^{-1}.
# ----------------------------------------------------------------------------
def pack_params(ws, bs, hidden_dim, embed_dim, num_j3, compute_dtype=jnp.bfloat16):
    f_base = hidden_dim + num_j3 * embed_dim + POSE_DIM
    wbase = np.zeros((f_base, POSE_DIM), np.float64)
    L = np.zeros((POSE_DIM, POSE_DIM), np.float64)   # ancestor (6x6) blocks
    bias = np.zeros((1, POSE_DIM), np.float64)
    gp_base = hidden_dim + num_j3 * embed_dim

    for j in range(NUM_JOINTS):
        W = np.asarray(ws[j], np.float64)
        cols = slice(j * NPOSE, (j + 1) * NPOSE)
        off = 0
        # x part
        wbase[0:hidden_dim, cols] += W[:, off:off + hidden_dim].T
        off += hidden_dim
        # 3d-joint embedding parts
        for ji in Joint3D_INDEX[j]:
            wbase[hidden_dim + ji * embed_dim: hidden_dim + (ji + 1) * embed_dim,
                  cols] += W[:, off:off + embed_dim].T
            off += embed_dim
        # ancestor-pose parts (strictly block-upper-triangular: a < j always)
        for a in ANCESTOR_INDEX[j]:
            L[a * NPOSE:(a + 1) * NPOSE, cols] += W[:, off:off + NPOSE].T
            off += NPOSE
        # global_pose slice (joint j's 6 columns)
        wbase[gp_base + j * NPOSE: gp_base + (j + 1) * NPOSE,
              cols] += W[:, off:off + 6].T
        off += 6
        assert off == W.shape[1]
        bias[0, cols] = np.asarray(bs[j], np.float64)

    # pose = acc + pose @ L  ==>  pose = acc @ (I - L)^{-1}; L nilpotent, so
    # the inverse is the finite Neumann series.
    M = np.eye(POSE_DIM)
    P = np.eye(POSE_DIM)
    for _ in range(NUM_JOINTS):
        P = P @ L
        if not np.any(P):
            break
        M = M + P

    W_eff = wbase @ M
    bias_eff = bias @ M

    w_x = jnp.asarray(W_eff[:hidden_dim], compute_dtype)
    w_e = jnp.asarray(W_eff[hidden_dim:gp_base], compute_dtype)
    w_g = jnp.asarray(W_eff[gp_base:], compute_dtype)
    bias_f32 = jnp.asarray(bias_eff, jnp.float32)
    return w_x, w_e, w_g, bias_f32


# ----------------------------------------------------------------------------
# Pure-JAX reference (mirrors the PyTorch forward loop exactly).
# ----------------------------------------------------------------------------
def ktd_reference(x, embed, gp, ws, bs):
    pose = []
    for j in range(NUM_JOINTS):
        parts = ([x]
                 + [embed[:, :, i] for i in Joint3D_INDEX[j]]
                 + [pose[a] for a in ANCESTOR_INDEX[j]]
                 + [gp[:, :, j * 6:(j + 1) * 6]])
        anc = jnp.concatenate(parts, axis=-1)
        pose.append(anc @ jnp.asarray(ws[j]).T + jnp.asarray(bs[j]))
    return jnp.concatenate(pose, axis=-1)


if __name__ == "__main__":
    # Small shapes consistent with the module's forward:
    B, T = 2, 8          # batch, sequence
    H = 64               # hidden_dim (x feature size)
    E = 32               # embed_dim per 3D joint
    J3 = 19              # number of 3D joints (Joint3D_INDEX references 0..18)

    key = jax.random.PRNGKey(0)
    kx, ke, kg, kp = jax.random.split(key, 4)
    x = jax.random.normal(kx, (B, T, H), jnp.float32)
    embed_3djoint = jax.random.normal(ke, (B, T, J3, E), jnp.float32)
    global_pose = jax.random.normal(kg, (B, T, POSE_DIM), jnp.float32)

    ws, bs = init_params(kp, H, E)
    ref = jax.block_until_ready(ktd_reference(x, embed_3djoint, global_pose, ws, bs))

    # (1) f32 verification path: the weight-folded kernel matches the
    # sequential recursion up to accumulation-order noise.
    params_f32 = pack_params(ws, bs, H, E, J3, compute_dtype=jnp.float32)
    out_f32 = jax.block_until_ready(
        ktd_pallas(x, embed_3djoint, global_pose, params_f32))
    np.testing.assert_allclose(np.asarray(out_f32), np.asarray(ref),
                               rtol=1e-4, atol=1e-5)

    # (2) Production configuration: bf16 weights AND bf16 activations
    # produced upstream (simulated here at test-construction time), f32 acc.
    x_bf = x.astype(jnp.bfloat16)
    embed_bf = embed_3djoint.astype(jnp.bfloat16)
    gp_bf = global_pose.astype(jnp.bfloat16)
    params_bf16 = pack_params(ws, bs, H, E, J3, compute_dtype=jnp.bfloat16)
    out_bf16 = jax.block_until_ready(
        ktd_pallas(x_bf, embed_bf, gp_bf, params_bf16))
    np.testing.assert_allclose(np.asarray(out_bf16, dtype=np.float32),
                               np.asarray(ref), rtol=2e-2, atol=2e-3)

    # (3) Optional fully-bf16 path (bf16 output writeback as well).
    out_bf16_out = jax.block_until_ready(
        ktd_pallas(x_bf, embed_bf, gp_bf, params_bf16, out_dtype=jnp.bfloat16))
    np.testing.assert_allclose(np.asarray(out_bf16_out, dtype=np.float32),
                               np.asarray(ref), rtol=3e-2, atol=5e-3)

    # TODO(synk): for fp8 activations on v7x (optional extra ~1.3-1.5x on the
    # embed stream), validate accuracy at production scale before enabling.
    print("KERNEL_OK")
</pallas_src>

<mosaic_0001>
module attributes {stable_mosaic.version = 11 : i64} {
  func.func @ktd_kernel(%arg0: i32, %arg1: memref<16x64xf32, #tpu.memory_space<vmem>>, %arg2: memref<16x608xf32, #tpu.memory_space<vmem>>, %arg3: memref<16x144xf32, #tpu.memory_space<vmem>>, %arg4: memref<64x144xf32, #tpu.memory_space<vmem>>, %arg5: memref<608x144xf32, #tpu.memory_space<vmem>>, %arg6: memref<144x144xf32, #tpu.memory_space<vmem>>, %arg7: memref<1x144xf32, #tpu.memory_space<vmem>>, %arg8: memref<16x144xf32, #tpu.memory_space<vmem>>) attributes {dimension_semantics = [#tpu.dimension_semantics<parallel>], iteration_bounds = array<i64: 1>, scalar_prefetch = 0 : i64, scratch_operands = 0 : i64, tpu.core_type = #tpu.core_type<tc>, window_params = [{transform_indices = @transform_0, window_bounds = array<i64: 16, 64>}, {transform_indices = @transform_1, window_bounds = array<i64: 16, 608>}, {transform_indices = @transform_2, window_bounds = array<i64: 16, 144>}, {pipeline_mode = #tpu.pipeline_mode<synchronous>, transform_indices = @transform_3, window_bounds = array<i64: 64, 144>}, {pipeline_mode = #tpu.pipeline_mode<synchronous>, transform_indices = @transform_4, window_bounds = array<i64: 608, 144>}, {pipeline_mode = #tpu.pipeline_mode<synchronous>, transform_indices = @transform_5, window_bounds = array<i64: 144, 144>}, {pipeline_mode = #tpu.pipeline_mode<synchronous>, transform_indices = @transform_6, window_bounds = array<i64: 1, 144>}, {transform_indices = @transform_7, window_bounds = array<i64: 16, 144>}]} {
    %c0 = arith.constant 0 : index
    %c0_0 = arith.constant 0 : index
    %0 = vector.load %arg4[%c0, %c0_0] : memref<64x144xf32, #tpu.memory_space<vmem>>, vector<64x144xf32>
    %c0_1 = arith.constant 0 : index
    %c0_2 = arith.constant 0 : index
    %1 = vector.load %arg5[%c0_1, %c0_2] : memref<608x144xf32, #tpu.memory_space<vmem>>, vector<608x144xf32>
    %c0_3 = arith.constant 0 : index
    %c0_4 = arith.constant 0 : index
    %2 = vector.load %arg6[%c0_3, %c0_4] : memref<144x144xf32, #tpu.memory_space<vmem>>, vector<144x144xf32>
    %c0_5 = arith.constant 0 : index
    %c0_6 = arith.constant 0 : index
    %3 = vector.load %arg1[%c0_5, %c0_6] : memref<16x64xf32, #tpu.memory_space<vmem>>, vector<16x64xf32>
    %cst = arith.constant dense<0.000000e+00> : vector<16x144xf32>
    %4 = tpu.matmul %3, %0, %cst {dimension_numbers = #tpu.dot_dimension_numbers<[1], [0], [0], [1], [0, 0, 1, 1], [], []>} : vector<16x64xf32>, vector<64x144xf32>, vector<16x144xf32> -> vector<16x144xf32>
    %c0_7 = arith.constant 0 : index
    %c0_8 = arith.constant 0 : index
    %5 = vector.load %arg2[%c0_7, %c0_8] : memref<16x608xf32, #tpu.memory_space<vmem>>, vector<16x608xf32>
    %cst_9 = arith.constant dense<0.000000e+00> : vector<16x144xf32>
    %6 = tpu.matmul %5, %1, %cst_9 {dimension_numbers = #tpu.dot_dimension_numbers<[1], [0], [0], [1], [0, 0, 1, 1], [], []>} : vector<16x608xf32>, vector<608x144xf32>, vector<16x144xf32> -> vector<16x144xf32>
    %7 = arith.addf %4, %6 : vector<16x144xf32>
    %c0_10 = arith.constant 0 : index
    %c0_11 = arith.constant 0 : index
    %8 = vector.load %arg3[%c0_10, %c0_11] : memref<16x144xf32, #tpu.memory_space<vmem>>, vector<16x144xf32>
    %cst_12 = arith.constant dense<0.000000e+00> : vector<16x144xf32>
    %9 = tpu.matmul %8, %2, %cst_12 {dimension_numbers = #tpu.dot_dimension_numbers<[1], [0], [0], [1], [0, 0, 1, 1], [], []>} : vector<16x144xf32>, vector<144x144xf32>, vector<16x144xf32> -> vector<16x144xf32>
    %10 = arith.addf %7, %9 : vector<16x144xf32>
    %c0_13 = arith.constant 0 : index
    %c0_14 = arith.constant 0 : index
    %11 = vector.load %arg7[%c0_13, %c0_14] : memref<1x144xf32, #tpu.memory_space<vmem>>, vector<1x144xf32>
    %12 = vector.broadcast %11 : vector<1x144xf32> to vector<16x144xf32>
    %13 = arith.addf %10, %12 : vector<16x144xf32>
    %c0_15 = arith.constant 0 : index
    %c0_16 = arith.constant 0 : index
    %14 = vector.load %arg8[%c0_15, %c0_16] : memref<16x144xf32, #tpu.memory_space<vmem>>, vector<16x144xf32>
    tpu.vector_store %arg8[%c0_15, %c0_16], %13 {strides = array<i32>} : memref<16x144xf32, #tpu.memory_space<vmem>>, vector<16x144xf32>,
    return
  }
  func.func @transform_0(%arg0: i32) -> (i32, i32) {
    %c0_i32 = arith.constant 0 : i32
    %c0_i32_0 = arith.constant 0 : i32
    return %arg0, %c0_i32 : i32, i32
  }
  func.func @transform_1(%arg0: i32) -> (i32, i32) {
    %c0_i32 = arith.constant 0 : i32
    %c0_i32_0 = arith.constant 0 : i32
    return %arg0, %c0_i32 : i32, i32
  }
  func.func @transform_2(%arg0: i32) -> (i32, i32) {
    %c0_i32 = arith.constant 0 : i32
    %c0_i32_0 = arith.constant 0 : i32
    return %arg0, %c0_i32 : i32, i32
  }
  func.func @transform_3(%arg0: i32) -> (i32, i32) {
    %c0_i32 = arith.constant 0 : i32
    %c0_i32_0 = arith.constant 0 : i32
    %c0_i32_1 = arith.constant 0 : i32
    return %c0_i32, %c0_i32_0 : i32, i32
  }
  func.func @transform_4(%arg0: i32) -> (i32, i32) {
    %c0_i32 = arith.constant 0 : i32
    %c0_i32_0 = arith.constant 0 : i32
    %c0_i32_1 = arith.constant 0 : i32
    return %c0_i32, %c0_i32_0 : i32, i32
  }
  func.func @transform_5(%arg0: i32) -> (i32, i32) {
    %c0_i32 = arith.constant 0 : i32
    %c0_i32_0 = arith.constant 0 : i32
    %c0_i32_1 = arith.constant 0 : i32
    return %c0_i32, %c0_i32_0 : i32, i32
  }
  func.func @transform_6(%arg0: i32) -> (i32, i32) {
    %c0_i32 = arith.constant 0 : i32
    %c0_i32_0 = arith.constant 0 : i32
    %c0_i32_1 = arith.constant 0 : i32
    return %c0_i32, %c0_i32_0 : i32, i32
  }
  func.func @transform_7(%arg0: i32) -> (i32, i32) {
    %c0_i32 = arith.constant 0 : i32
    %c0_i32_0 = arith.constant 0 : i32
    return %arg0, %c0_i32 : i32, i32
  }
}

</mosaic_0001>

<bundles_post_ra>
// kernel: tpu_custom_call.1
= control target key start
LH: loop header
LB: loop body
LE: loop exit
PB: predicated region body
PF: predicated region fallthrough
CT: control target
= control target key end

     0   :  { %vm569_vm0 = vcmask 130048   ;;  %s1676_s0 = inlined_call_operand.vmem [shape: f32[16,64], index: 0, kind: input, shape index: {}]   ;;  %s1677_s1 = inlined_call_operand.vmem [shape: f32[16,608], index: 1, kind: input, shape index: {}]   ;;  %s1678_s2 = inlined_call_operand.vmem [shape: f32[16,144], index: 2, kind: input, shape index: {}]   ;;  %s1679_s3 = inlined_call_operand.vmem [shape: f32[64,144], index: 3, kind: input, shape index: {}]   ;;  %s1680_s4 = inlined_call_operand.vmem [shape: f32[608,144], index: 4, kind: input, shape index: {}]   ;;  %s1681_s5 = inlined_call_operand.vmem [shape: f32[144,144], index: 5, kind: input, shape index: {}]   ;;  %s1682_s6 = inlined_call_operand.vmem [shape: f32[1,144], index: 6, kind: input, shape index: {}]   ;;  %s1683_s7 = inlined_call_operand.hbm [shape: f32[16,144], index: 7, kind: output, shape index: {}]  }
   0x1   :  { %v108_v0 = vld [vmem:[%s1680_s4 + $0x208] sm:$0xff]  ;;  %v110_v1 = vld [vmem:[%s1680_s4 + $0x218] sm:$0xff]  ;;  %v107_v2 = vld [vmem:[%s1680_s4 + $0x200] sm:$0xff] }
   0x2   :  { %v763_v3 = vpack.c.bf16 %v110_v1, %v108_v0  ;;  %v109_v4 = vld [vmem:[%s1680_s4 + $0x210] sm:$0xff]  ;;  %v112_v5 = vld [vmem:[%s1680_s4 + $0x228] sm:$0xff]  ;;  %v114_v6 = vld [vmem:[%s1680_s4 + $0x238] sm:$0xff] }
   0x3   :  { %v765_v7 = vpack.c.bf16 %v109_v4, %v107_v2  ;;  %v767_v8 = vpack.c.bf16 %v114_v6, %v112_v5  ;;  %v44_v9 = vld [vmem:[%s1680_s4 + $0x8] sm:$0xff]  ;;  %v46_v10 = vld [vmem:[%s1680_s4 + $0x18] sm:$0xff]  ;;  %v111_v11 = vld [vmem:[%s1680_s4 + $0x220] sm:$0xff] }
   0x4   :  { %764 = vmatprep.subr.bf16.mxu0 %v763_v3  ;;  %v699_v12 = vpack.c.bf16 %v46_v10, %v44_v9  ;;  %v113_v13 = vld [vmem:[%s1680_s4 + $0x230] sm:$0xff]  ;;  %v43_v14 = vld [vmem:[%s1680_s4] sm:$0xff]  ;;  %v116_v18 = vld [vmem:[%s1680_s4 + $0x248] sm:$0xff] }
   0x5   :  { %v45_v15 = vld [vmem:[%s1680_s4 + $0x10] sm:$0xff]  ;;  %766 = vmatpush1.bf16.msra.mxu0 %v765_v7  ;;  %v769_v16 = vpack.c.bf16 %v113_v13, %v111_v11  ;;  %v118_v19 = vld [vmem:[%s1680_s4 + $0x258] sm:$0xff]  ;;  %v48_v20 = vld [vmem:[%s1680_s4 + $0x28] sm:$0xff] }
   0x6   :  { %v701_v17 = vpack.c.bf16 %v45_v15, %v43_v14  ;;  %768 = vmatprep.subr.bf16.mxu0 %v767_v8  ;;  %700 = vmatprep.subr.bf16.mxu1 %v699_v12  ;;  %v771_v21 = vpack.c.bf16 %v118_v19, %v116_v18  ;;  %v50_v22 = vld [vmem:[%s1680_s4 + $0x38] sm:$0xff]  ;;  %v115_v23 = vld [vmem:[%s1680_s4 + $0x240] sm:$0xff]  ;;  %v117_v24 = vld [vmem:[%s1680_s4 + $0x250] sm:$0xff] }
   0x7   :  { %v703_v25 = vpack.c.bf16 %v50_v22, %v48_v20  ;;  %v47_v26 = vld [vmem:[%s1680_s4 + $0x20] sm:$0xff]  ;;  %v49_v27 = vld [vmem:[%s1680_s4 + $0x30] sm:$0xff]  ;;  %v120_v28 = vld [vmem:[%s1680_s4 + $0x268] sm:$0xff]  ;;  %v773_v33 = vpack.c.bf16 %v117_v24, %v115_v23 }
   0x8   :  { %702 = vmatpush1.bf16.msra.mxu1 %v701_v17  ;;  %v705_v29 = vpack.c.bf16 %v49_v27, %v47_v26  ;;  %v122_v30 = vld [vmem:[%s1680_s4 + $0x278] sm:$0xff]  ;;  %v52_v31 = vld [vmem:[%s1680_s4 + $0x48] sm:$0xff]  ;;  %v119_v35 = vld [vmem:[%s1680_s4 + $0x260] sm:$0xff] }
   0x9   :  { %v54_v32 = vld [vmem:[%s1680_s4 + $0x58] sm:$0xff]  ;;  %770 = vmatpush1.bf16.msra.mxu0 %v769_v16  ;;  %704 = vmatprep.subr.bf16.mxu1 %v703_v25  ;;  %v51_v36 = vld [vmem:[%s1680_s4 + $0x40] sm:$0xff]  ;;  %v775_v37 = vpack.c.bf16 %v122_v30, %v120_v28  ;;  %v121_v38 = vld [vmem:[%s1680_s4 + $0x270] sm:$0xff] }
   0xa   :  { %v707_v34 = vpack.c.bf16 %v54_v32, %v52_v31  ;;  %772 = vmatprep.subr.bf16.mxu0 %v771_v21  ;;  %v53_v39 = vld [vmem:[%s1680_s4 + $0x50] sm:$0xff]  ;;  %v124_v40 = vld [vmem:[%s1680_s4 + $0x288] sm:$0xff]  ;;  %v126_v42 = vld [vmem:[%s1680_s4 + $0x298] sm:$0xff]  ;;  %v777_v48 = vpack.c.bf16 %v121_v38, %v119_v35 }
   0xb   :  { %v709_v41 = vpack.c.bf16 %v53_v39, %v51_v36  ;;  %v56_v43 = vld [vmem:[%s1680_s4 + $0x68] sm:$0xff]  ;;  %v58_v44 = vld [vmem:[%s1680_s4 + $0x78] sm:$0xff]  ;;  %v55_v46 = vld [vmem:[%s1680_s4 + $0x60] sm:$0xff]  ;;  %v779_v50 = vpack.c.bf16 %v126_v42, %v124_v40 }
   0xc   :  { %706 = vmatpush1.bf16.msra.mxu1 %v705_v29  ;;  %v711_v45 = vpack.c.bf16 %v58_v44, %v56_v43  ;;  %v57_v47 = vld [vmem:[%s1680_s4 + $0x70] sm:$0xff]  ;;  %v60_v49 = vld [vmem:[%s1680_s4 + $0x88] sm:$0xff]  ;;  %v123_v51 = vld [vmem:[%s1680_s4 + $0x280] sm:$0xff] }
   0xd   :  { %708 = vmatprep.subr.bf16.mxu1 %v707_v34  ;;  %774 = vmatpush1.bf16.msra.mxu0 %v773_v33  ;;  %v125_v52 = vld [vmem:[%s1680_s4 + $0x290] sm:$0xff]  ;;  %v62_v53 = vld [vmem:[%s1680_s4 + $0x98] sm:$0xff]  ;;  %v713_v54 = vpack.c.bf16 %v57_v47, %v55_v46  ;;  %v128_v55 = vld [vmem:[%s1680_s4 + $0x2a8] sm:$0xff] }
   0xe   :  { %776 = vmatprep.subr.bf16.mxu0 %v775_v37  ;;  %v130_v56 = vld [vmem:[%s1680_s4 + $0x2b8] sm:$0xff]  ;;  %v715_v57 = vpack.c.bf16 %v62_v53, %v60_v49  ;;  %v59_v58 = vld [vmem:[%s1680_s4 + $0x80] sm:$0xff]  ;;  %v61_v59 = vld [vmem:[%s1680_s4 + $0x90] sm:$0xff]  ;;  %v781_v60 = vpack.c.bf16 %v125_v52, %v123_v51 }
   0xf   :  { %v64_v61 = vld [vmem:[%s1680_s4 + $0xa8] sm:$0xff]  ;;  %v66_v62 = vld [vmem:[%s1680_s4 + $0xb8] sm:$0xff]  ;;  %v783_v63 = vpack.c.bf16 %v130_v56, %v128_v55  ;;  %v127_v0 = vld [vmem:[%s1680_s4 + $0x2a0] sm:$0xff]  ;;  %v717_v2 = vpack.c.bf16 %v61_v59, %v59_v58 }
  0x10   :  { %710 = vmatpush1.bf16.msra.mxu1 %v709_v41  ;;  %v129_v1 = vld [vmem:[%s1680_s4 + $0x2b0] sm:$0xff]  ;;  %v132_v3 = vld [vmem:[%s1680_s4 + $0x2c8] sm:$0xff]  ;;  %v134_v4 = vld [vmem:[%s1680_s4 + $0x2d8] sm:$0xff]  ;;  %v719_v5 = vpack.c.bf16 %v66_v62, %v64_v61 }
  0x11   :  { %712 = vmatprep.subr.bf16.mxu1 %v711_v45  ;;  %778 = vmatpush1.bf16.msra.mxu0 %v777_v48  ;;  %v63_v6 = vld [vmem:[%s1680_s4 + $0xa0] sm:$0xff]  ;;  %v65_v7 = vld [vmem:[%s1680_s4 + $0xb0] sm:$0xff]  ;;  %v785_v8 = vpack.c.bf16 %v129_v1, %v127_v0  ;;  %v68_v9 = vld [vmem:[%s1680_s4 + $0xc8] sm:$0xff]  ;;  %v787_v11 = vpack.c.bf16 %v134_v4, %v132_v3 }
  0x12   :  { %780 = vmatprep.subr.bf16.mxu0 %v779_v50  ;;  %v70_v10 = vld [vmem:[%s1680_s4 + $0xd8] sm:$0xff]  ;;  %v131_v12 = vld [vmem:[%s1680_s4 + $0x2c0] sm:$0xff]  ;;  %v133_v13 = vld [vmem:[%s1680_s4 + $0x2d0] sm:$0xff]  ;;  %v721_v14 = vpack.c.bf16 %v65_v7, %v63_v6 }
  0x13   :  { %v136_v15 = vld [vmem:[%s1680_s4 + $0x2e8] sm:$0xff]  ;;  %v138_v16 = vld [vmem:[%s1680_s4 + $0x2f8] sm:$0xff]  ;;  %v723_v17 = vpack.c.bf16 %v70_v10, %v68_v9  ;;  %v67_v18 = vld [vmem:[%s1680_s4 + $0xc0] sm:$0xff]  ;;  %v789_v20 = vpack.c.bf16 %v133_v13, %v131_v12 }
  0x14   :  { %714 = vmatpush1.bf16.msra.mxu1 %v713_v54  ;;  %v69_v19 = vld [vmem:[%s1680_s4 + $0xd0] sm:$0xff]  ;;  %v72_v21 = vld [vmem:[%s1680_s4 + $0xe8] sm:$0xff]  ;;  %v74_v22 = vld [vmem:[%s1680_s4 + $0xf8] sm:$0xff]  ;;  %v791_v23 = vpack.c.bf16 %v138_v16, %v136_v15 }
  0x15   :  { %716 = vmatprep.subr.bf16.mxu1 %v715_v57  ;;  %782 = vmatpush1.bf16.msra.mxu0 %v781_v60  ;;  %v135_v24 = vld [vmem:[%s1680_s4 + $0x2e0] sm:$0xff]  ;;  %v137_v25 = vld [vmem:[%s1680_s4 + $0x2f0] sm:$0xff]  ;;  %v725_v26 = vpack.c.bf16 %v69_v19, %v67_v18  ;;  %v140_v27 = vld [vmem:[%s1680_s4 + $0x308] sm:$0xff]  ;;  %v727_v29 = vpack.c.bf16 %v74_v22, %v72_v21 }
  0x16   :  { %784 = vmatprep.subr.bf16.mxu0 %v783_v63  ;;  %v142_v28 = vld [vmem:[%s1680_s4 + $0x318] sm:$0xff]  ;;  %v71_v30 = vld [vmem:[%s1680_s4 + $0xe0] sm:$0xff]  ;;  %v73_v31 = vld [vmem:[%s1680_s4 + $0xf0] sm:$0xff]  ;;  %v793_v32 = vpack.c.bf16 %v137_v25, %v135_v24 }
  0x17   :  { %v76_v33 = vld [vmem:[%s1680_s4 + $0x108] sm:$0xff]  ;;  %v78_v34 = vld [vmem:[%s1680_s4 + $0x118] sm:$0xff]  ;;  %v795_v35 = vpack.c.bf16 %v142_v28, %v140_v27  ;;  %v139_v36 = vld [vmem:[%s1680_s4 + $0x300] sm:$0xff]  ;;  %v729_v38 = vpack.c.bf16 %v73_v31, %v71_v30 }
  0x18   :  { %718 = vmatpush1.bf16.msra.mxu1 %v717_v2  ;;  %v141_v37 = vld [vmem:[%s1680_s4 + $0x310] sm:$0xff]  ;;  %v144_v39 = vld [vmem:[%s1680_s4 + $0x328] sm:$0xff]  ;;  %v146_v40 = vld [vmem:[%s1680_s4 + $0x338] sm:$0xff]  ;;  %v731_v41 = vpack.c.bf16 %v78_v34, %v76_v33 }
  0x19   :  { %720 = vmatprep.subr.bf16.mxu1 %v719_v5  ;;  %786 = vmatpush1.bf16.msra.mxu0 %v785_v8  ;;  %v75_v42 = vld [vmem:[%s1680_s4 + $0x100] sm:$0xff]  ;;  %v77_v43 = vld [vmem:[%s1680_s4 + $0x110] sm:$0xff]  ;;  %v797_v44 = vpack.c.bf16 %v141_v37, %v139_v36  ;;  %v80_v45 = vld [vmem:[%s1680_s4 + $0x128] sm:$0xff]  ;;  %v799_v47 = vpack.c.bf16 %v146_v40, %v144_v39 }
  0x1a   :  { %788 = vmatprep.subr.bf16.mxu0 %v787_v11  ;;  %v82_v46 = vld [vmem:[%s1680_s4 + $0x138] sm:$0xff]  ;;  %v143_v48 = vld [vmem:[%s1680_s4 + $0x320] sm:$0xff]  ;;  %v145_v49 = vld [vmem:[%s1680_s4 + $0x330] sm:$0xff]  ;;  %v733_v50 = vpack.c.bf16 %v77_v43, %v75_v42 }
  0x1b   :  { %v148_v51 = vld [vmem:[%s1680_s4 + $0x348] sm:$0xff]  ;;  %v150_v52 = vld [vmem:[%s1680_s4 + $0x358] sm:$0xff]  ;;  %v735_v53 = vpack.c.bf16 %v82_v46, %v80_v45  ;;  %v79_v54 = vld [vmem:[%s1680_s4 + $0x120] sm:$0xff]  ;;  %v801_v56 = vpack.c.bf16 %v145_v49, %v143_v48 }
  0x1c   :  { %722 = vmatpush1.bf16.msra.mxu1 %v721_v14  ;;  %v81_v55 = vld [vmem:[%s1680_s4 + $0x130] sm:$0xff]  ;;  %v84_v57 = vld [vmem:[%s1680_s4 + $0x148] sm:$0xff]  ;;  %v86_v58 = vld [vmem:[%s1680_s4 + $0x158] sm:$0xff]  ;;  %v803_v59 = vpack.c.bf16 %v150_v52, %v148_v51 }
  0x1d   :  { %724 = vmatprep.subr.bf16.mxu1 %v723_v17  ;;  %790 = vmatpush1.bf16.msra.mxu0 %v789_v20  ;;  %v147_v60 = vld [vmem:[%s1680_s4 + $0x340] sm:$0xff]  ;;  %v149_v61 = vld [vmem:[%s1680_s4 + $0x350] sm:$0xff]  ;;  %v737_v62 = vpack.c.bf16 %v81_v55, %v79_v54  ;;  %v152_v63 = vld [vmem:[%s1680_s4 + $0x368] sm:$0xff]  ;;  %v739_v1 = vpack.c.bf16 %v86_v58, %v84_v57 }
  0x1e   :  { %792 = vmatprep.subr.bf16.mxu0 %v791_v23  ;;  %v154_v0 = vld [vmem:[%s1680_s4 + $0x378] sm:$0xff]  ;;  %v83_v2 = vld [vmem:[%s1680_s4 + $0x140] sm:$0xff]  ;;  %v85_v3 = vld [vmem:[%s1680_s4 + $0x150] sm:$0xff]  ;;  %v805_v4 = vpack.c.bf16 %v149_v61, %v147_v60 }
  0x1f   :  { %v88_v5 = vld [vmem:[%s1680_s4 + $0x168] sm:$0xff]  ;;  %v90_v6 = vld [vmem:[%s1680_s4 + $0x178] sm:$0xff]  ;;  %v807_v7 = vpack.c.bf16 %v154_v0, %v152_v63  ;;  %v151_v8 = vld [vmem:[%s1680_s4 + $0x360] sm:$0xff]  ;;  %v741_v11 = vpack.c.bf16 %v85_v3, %v83_v2 }
  0x20   :  { %726 = vmatpush1.bf16.msra.mxu1 %v725_v26  ;;  %v153_v9 = vld [vmem:[%s1680_s4 + $0x370] sm:$0xff]  ;;  %v236_v10 = vld [vmem:[%s1677_s1 + $0x18] sm:$0xff]  ;;  %v156_v12 = vld [vmem:[%s1680_s4 + $0x388] sm:$0xff]  ;;  %v743_v14 = vpack.c.bf16 %v90_v6, %v88_v5 }
  0x21   :  { %728 = vmatprep.subr.bf16.mxu1 %v727_v29  ;;  %794 = vmatpush1.bf16.msra.mxu0 %v793_v32  ;;  %v158_v13 = vld [vmem:[%s1680_s4 + $0x398] sm:$0xff]  ;;  %v87_v15 = vld [vmem:[%s1680_s4 + $0x160] sm:$0xff]  ;;  %v89_v16 = vld [vmem:[%s1680_s4 + $0x170] sm:$0xff]  ;;  %v809_v17 = vpack.c.bf16 %v153_v9, %v151_v8 }
  0x22   :  { %796 = vmatprep.subr.bf16.mxu0 %v795_v35  ;;  %391 = vmatprep.mubr.f32.mxu0 %v236_v10  ;;  %v92_v18 = vld [vmem:[%s1680_s4 + $0x188] sm:$0xff]  ;;  %v94_v19 = vld [vmem:[%s1680_s4 + $0x198] sm:$0xff]  ;;  %v811_v20 = vpack.c.bf16 %v158_v13, %v156_v12  ;;  %v155_v21 = vld [vmem:[%s1680_s4 + $0x380] sm:$0xff]  ;;  %v745_v24 = vpack.c.bf16 %v89_v16, %v87_v15 }
  0x23   :  { %v157_v22 = vld [vmem:[%s1680_s4 + $0x390] sm:$0xff]  ;;  %v234_v23 = vld [vmem:[%s1677_s1 + $0x8] sm:$0xff]  ;;  %v162_v26 = vld [vmem:[%s1680_s4 + $0x3b8] sm:$0xff]  ;;  %v747_v27 = vpack.c.bf16 %v94_v19, %v92_v18 }
  0x24   :  { %730 = vmatpush1.bf16.msra.mxu1 %v729_v38  ;;  %v160_v25 = vld [vmem:[%s1680_s4 + $0x3a8] sm:$0xff]  ;;  %314 = vmatprep.mubr.f32.mxu1 %v234_v23  ;;  %v91_v28 = vld [vmem:[%s1680_s4 + $0x180] sm:$0xff]  ;;  %v93_v29 = vld [vmem:[%s1680_s4 + $0x190] sm:$0xff]  ;;  %v813_v30 = vpack.c.bf16 %v157_v22, %v155_v21 }
  0x25   :  { %732 = vmatprep.subr.bf16.mxu1 %v731_v41  ;;  %798 = vmatpush1.bf16.msra.mxu0 %v797_v44  ;;  %v96_v31 = vld [vmem:[%s1680_s4 + $0x1a8] sm:$0xff]  ;;  %v98_v32 = vld [vmem:[%s1680_s4 + $0x1b8] sm:$0xff]  ;;  %v815_v33 = vpack.c.bf16 %v162_v26, %v160_v25  ;;  %v159_v34 = vld [vmem:[%s1680_s4 + $0x3a0] sm:$0xff]  ;;  %v749_v36 = vpack.c.bf16 %v93_v29, %v91_v28 }
  0x26   :  { %800 = vmatprep.subr.bf16.mxu0 %v799_v47  ;;  %v161_v35 = vld [vmem:[%s1680_s4 + $0x3b0] sm:$0xff]  ;;  %v164_v37 = vld [vmem:[%s1680_s4 + $0x3c8] sm:$0xff]  ;;  %v166_v38 = vld [vmem:[%s1680_s4 + $0x3d8] sm:$0xff]  ;;  %v751_v39 = vpack.c.bf16 %v98_v32, %v96_v31 }
  0x27   :  { %v95_v40 = vld [vmem:[%s1680_s4 + $0x1a0] sm:$0xff]  ;;  %v97_v41 = vld [vmem:[%s1680_s4 + $0x1b0] sm:$0xff]  ;;  %v817_v42 = vpack.c.bf16 %v161_v35, %v159_v34  ;;  %v100_v43 = vld [vmem:[%s1680_s4 + $0x1c8] sm:$0xff]  ;;  %v819_v45 = vpack.c.bf16 %v166_v38, %v164_v37 }
  0x28   :  { %734 = vmatpush1.bf16.msra.mxu1 %v733_v50  ;;  %v102_v44 = vld [vmem:[%s1680_s4 + $0x1d8] sm:$0xff]  ;;  %v163_v46 = vld [vmem:[%s1680_s4 + $0x3c0] sm:$0xff]  ;;  %v165_v47 = vld [vmem:[%s1680_s4 + $0x3d0] sm:$0xff]  ;;  %v753_v48 = vpack.c.bf16 %v97_v41, %v95_v40 }
  0x29   :  { %736 = vmatprep.subr.bf16.mxu1 %v735_v53  ;;  %802 = vmatpush1.bf16.msra.mxu0 %v801_v56  ;;  %v168_v49 = vld [vmem:[%s1680_s4 + $0x3e8] sm:$0xff]  ;;  %v170_v50 = vld [vmem:[%s1680_s4 + $0x3f8] sm:$0xff]  ;;  %v755_v51 = vpack.c.bf16 %v102_v44, %v100_v43  ;;  %v99_v52 = vld [vmem:[%s1680_s4 + $0x1c0] sm:$0xff]  ;;  %v821_v54 = vpack.c.bf16 %v165_v47, %v163_v46 }
  0x2a   :  { %804 = vmatprep.subr.bf16.mxu0 %v803_v59  ;;  %v101_v53 = vld [vmem:[%s1680_s4 + $0x1d0] sm:$0xff]  ;;  %v104_v55 = vld [vmem:[%s1680_s4 + $0x1e8] sm:$0xff]  ;;  %v106_v56 = vld [vmem:[%s1680_s4 + $0x1f8] sm:$0xff]  ;;  %v823_v57 = vpack.c.bf16 %v170_v50, %v168_v49 }
  0x2b   :  { %v167_v58 = vld [vmem:[%s1680_s4 + $0x3e0] sm:$0xff]  ;;  %v169_v59 = vld [vmem:[%s1680_s4 + $0x3f0] sm:$0xff]  ;;  %v757_v60 = vpack.c.bf16 %v101_v53, %v99_v52  ;;  %v172_v61 = vld [vmem:[%s1680_s4 + $0x408] sm:$0xff]  ;;  %v759_v63 = vpack.c.bf16 %v106_v56, %v104_v55 }
  0x2c   :  { %738 = vmatpush1.bf16.msra.mxu1 %v737_v62  ;;  %v174_v62 = vld [vmem:[%s1680_s4 + $0x418] sm:$0xff]  ;;  %v103_v0 = vld [vmem:[%s1680_s4 + $0x1e0] sm:$0xff]  ;;  %v825_v2 = vpack.c.bf16 %v169_v59, %v167_v58  ;;  %v196_v3 = vld [vmem:[%s1681_s5 + $0x8] sm:$0xff] }
  0x2d   :  { %740 = vmatprep.subr.bf16.mxu1 %v739_v1  ;;  %806 = vmatpush1.bf16.msra.mxu0 %v805_v4  ;;  %v105_v1 = vld [vmem:[%s1680_s4 + $0x1f0] sm:$0xff]  ;;  %v198_v4 = vld [vmem:[%s1681_s5 + $0x18] sm:$0xff]  ;;  %v827_v5 = vpack.c.bf16 %v174_v62, %v172_v61  ;;  %v171_v6 = vld [vmem:[%s1680_s4 + $0x400] sm:$0xff] }
  0x2e   :  { %808 = vmatprep.subr.bf16.mxu0 %v807_v7  ;;  %v173_v7 = vld [vmem:[%s1680_s4 + $0x410] sm:$0xff]  ;;  %v761_v8 = vpack.c.bf16 %v105_v1, %v103_v0  ;;  %v176_v9 = vld [vmem:[%s1680_s4 + $0x428] sm:$0xff]  ;;  %v178_v10 = vld [vmem:[%s1680_s4 + $0x438] sm:$0xff] }
  0x2f   :  { %v195_v12 = vld [vmem:[%s1681_s5] sm:$0xff]  ;;  %v197_v13 = vld [vmem:[%s1681_s5 + $0x10] sm:$0xff]  ;;  %v829_v15 = vpack.c.bf16 %v173_v7, %v171_v6  ;;  %v200_v16 = vld [vmem:[%s1681_s5 + $0x28] sm:$0xff]  ;;  %v831_v18 = vpack.c.bf16 %v178_v10, %v176_v9 }
  0x30   :  { %742 = vmatpush1.bf16.msra.mxu1 %v741_v11  ;;  %v867_v11 = vpack.c.bf16 %v198_v4, %v196_v3  ;;  %v175_v19 = vld [vmem:[%s1680_s4 + $0x420] sm:$0xff]  ;;  %v869_v23 = vpack.c.bf16 %v197_v13, %v195_v12  ;;  %v182_v25 = vld [vmem:[%s1680_s4 + $0x458] sm:$0xff]  ;;  %v201_v28 = vld [vmem:[%s1681_s5 + $0x30] sm:$0xff] }
  0x31   :  { %744 = vmatprep.subr.bf16.mxu1 %v743_v14  ;;  %810 = vmatpush1.bf16.msra.mxu0 %v809_v17  ;;  %v235_v14 = vld [vmem:[%s1677_s1 + $0x10] sm:$0xff]  ;;  %v202_v17 = vld [vmem:[%s1681_s5 + $0x38] sm:$0xff]  ;;  %v241_v21 = vld [vmem:[%s1677_s1 + $0x40] sm:$0xff] }
  0x32   :  { %812 = vmatprep.subr.bf16.mxu0 %v811_v20  ;;  %v177_v20 = vld [vmem:[%s1680_s4 + $0x430] sm:$0xff]  ;;  %v233_v22 = vld [vmem:[%s1677_s1] sm:$0xff]  ;;  %v871_v26 = vpack.c.bf16 %v202_v17, %v200_v16  ;;  %v204_v31 = vld [vmem:[%s1681_s5 + $0x48] sm:$0xff] }
  0x33   :  { %v239_v29 = vld [vmem:[%s1677_s1 + $0x30] sm:$0xff]  ;;  %v206_v32 = vld [vmem:[%s1681_s5 + $0x58] sm:$0xff]  ;;  %v179_v35 = vld [vmem:[%s1680_s4 + $0x440] sm:$0xff] }
  0x34   :  { %746 = vmatpush1.bf16.msra.mxu1 %v745_v24  ;;  %v180_v24 = vld [vmem:[%s1680_s4 + $0x448] sm:$0xff]  ;;  %v875_v41 = vpack.c.bf16 %v206_v32, %v204_v31  ;;  %v205_v43 = vld [vmem:[%s1681_s5 + $0x50] sm:$0xff]  ;;  %v210_v47 = vld [vmem:[%s1681_s5 + $0x78] sm:$0xff] }
  0x35   :  { %748 = vmatprep.subr.bf16.mxu1 %v747_v27  ;;  %814 = vmatpush1.bf16.msra.mxu0 %v813_v30  ;;  %v199_v27 = vld [vmem:[%s1681_s5 + $0x20] sm:$0xff]  ;;  %v833_v30 = vpack.c.bf16 %v177_v20, %v175_v19  ;;  %v835_v34 = vpack.c.bf16 %v182_v25, %v180_v24  ;;  %v184_v38 = vld [vmem:[%s1680_s4 + $0x468] sm:$0xff] }
  0x36   :  { %816 = vmatprep.subr.bf16.mxu0 %v815_v33  ;;  %v240_v33 = vld [vmem:[%s1677_s1 + $0x38] sm:$0xff]  ;;  %v873_v37 = vpack.c.bf16 %v201_v28, %v199_v27  ;;  %v238_v40 = vld [vmem:[%s1677_s1 + $0x28] sm:$0xff]  ;;  %v183_v50 = vld [vmem:[%s1680_s4 + $0x460] sm:$0xff] }
  0x37   :  { %v566_v44 = vld [vmem:[%s1678_s2 + $0x8] sm:$0xff] }
  0x38   :  { %750 = vmatpush1.bf16.msra.mxu1 %v749_v36  ;;  %v181_v36 = vld [vmem:[%s1680_s4 + $0x450] sm:$0xff]  ;;  %v208_v46 = vld [vmem:[%s1681_s5 + $0x68] sm:$0xff] }
  0x39   :  { %752 = vmatprep.subr.bf16.mxu1 %v751_v39  ;;  %818 = vmatpush1.bf16.msra.mxu0 %v817_v42  ;;  %v186_v39 = vld [vmem:[%s1680_s4 + $0x478] sm:$0xff]  ;;  %v203_v42 = vld [vmem:[%s1681_s5 + $0x40] sm:$0xff] }
  0x3a   :  { %820 = vmatprep.subr.bf16.mxu0 %v819_v45  ;;  %v837_v45 = vpack.c.bf16 %v181_v36, %v179_v35  ;;  %v839_v49 = vpack.c.bf16 %v186_v39, %v184_v38 }
  0x3c   :  { %754 = vmatpush1.bf16.msra.mxu1 %v753_v48  ;;  %v947_v48 = vmov 0.0  }
  0x3d   :  { %756 = vmatprep.subr.bf16.mxu1 %v755_v51  ;;  %822 = vmatpush1.bf16.msra.mxu0 %v821_v54  ;;  %v185_v51 = vld [vmem:[%s1680_s4 + $0x470] sm:$0xff] }
  0x3e   :  { %824 = vmatprep.subr.bf16.mxu0 %v823_v57 }
  0x40   :  { %758 = vmatpush1.bf16.msra.mxu1 %v757_v60 }
  0x41   :  { %760 = vmatprep.subr.bf16.mxu1 %v759_v63  ;;  %826 = vmatpush1.bf16.msra.mxu0 %v825_v2 }
  0x42   :  { %828 = vmatprep.subr.bf16.mxu0 %v827_v5 }
  0x44   :  { %762 = vmatpush1.bf16.msra.mxu1 %v761_v8  ;;  %392 = vmatmul.mubr.f32.vlgmr.msra.gmra.mrb[0].mxu0 %v235_v14 }
  0x45   :  { %868 = vmatprep.subr.bf16.mxu1 %v867_v11  ;;  %830 = vmatpush1.bf16.msra.mxu0 %v829_v15 }
  0x46   :  { %397 = vmatprep.mubr.f32.mxu0 %v241_v21  ;;  %832 = vmatprep.subr.bf16.mxu0 %v831_v18 }
  0x47   :  { %315 = vmatmul.mubr.f32.vlgmr.msra.gmra.mrb[0].mxu1 %v233_v22 }
  0x48   :  { %870 = vmatpush1.bf16.msra.mxu1 %v869_v23  ;;  %320 = vmatprep.mubr.f32.mxu1 %v239_v29 }
  0x49   :  { %872 = vmatprep.subr.bf16.mxu1 %v871_v26  ;;  %398 = vmatmul.mubr.f32.gmra.mrb[2].mxu0 %v240_v33 }
  0x4a   :  { %834 = vmatpush1.bf16.msra.mxu0 %v833_v30  ;;  %468 = vmatprep.mubr.f32.mxu0 %v947_v48 }
  0x4b   :  { %836 = vmatprep.subr.bf16.mxu0 %v835_v34  ;;  %321 = vmatmul.mubr.f32.gmra.mrb[2].mxu1 %v238_v40 }
  0x4c   :  { %12 = vsyncpa [#allocation3], 0  ;;  %874 = vmatpush1.bf16.msra.mxu1 %v873_v37  ;;  %v877_v52 = vpack.c.bf16 %v205_v43, %v203_v42  ;;  %v188_v53 = vld [vmem:[%s1680_s4 + $0x488] sm:$0xff]  ;;  %v190_v54 = vld [vmem:[%s1680_s4 + $0x498] sm:$0xff]  ;;  %697 = vmatprep.mubr.msk.f32.mxu1 %vm569_vm0, %v566_v44  ;;  %v879_v55 = vpack.c.bf16 %v210_v47, %v208_v46  ;;  %v841_v58 = vpack.c.bf16 %v185_v51, %v183_v50  ;;  %vm243_vm1 = vcmask 785408  }
  0x4d   :  { %876 = vmatprep.subr.bf16.mxu1 %v875_v41  ;;  %v207_v56 = vld [vmem:[%s1681_s5 + $0x60] sm:$0xff]  ;;  %v209_v57 = vld [vmem:[%s1681_s5 + $0x70] sm:$0xff]  ;;  %v212_v59 = vld [vmem:[%s1681_s5 + $0x88] sm:$0xff]  ;;  %v843_v61 = vpack.c.bf16 %v190_v54, %v188_v53  ;;  %vm481_vm2 = vcmask 523264  }
  0x4e   :  { %838 = vmatpush1.bf16.msra.mxu0 %v837_v45  ;;  %v214_v60 = vld [vmem:[%s1681_s5 + $0x98] sm:$0xff]  ;;  %v187_v62 = vld [vmem:[%s1680_s4 + $0x480] sm:$0xff]  ;;  %v189_v63 = vld [vmem:[%s1680_s4 + $0x490] sm:$0xff]  ;;  %v881_v0 = vpack.c.bf16 %v209_v57, %v207_v56 }
  0x4f   :  { %840 = vmatprep.subr.bf16.mxu0 %v839_v49  ;;  %v192_v1 = vld [vmem:[%s1680_s4 + $0x4a8] sm:$0xff]  ;;  %v194_v2 = vld [vmem:[%s1680_s4 + $0x4b8] sm:$0xff]  ;;  %v883_v3 = vpack.c.bf16 %v214_v60, %v212_v59  ;;  %v211_v4 = vld [vmem:[%s1681_s5 + $0x80] sm:$0xff]  ;;  %v845_v6 = vpack.c.bf16 %v189_v63, %v187_v62 }
  0x50   :  { %878 = vmatpush1.bf16.msra.mxu1 %v877_v52  ;;  %v213_v5 = vld [vmem:[%s1681_s5 + $0x90] sm:$0xff]  ;;  %v216_v7 = vld [vmem:[%s1681_s5 + $0xa8] sm:$0xff]  ;;  %v218_v8 = vld [vmem:[%s1681_s5 + $0xb8] sm:$0xff]  ;;  %v847_v9 = vpack.c.bf16 %v194_v2, %v192_v1 }
  0x51   :  { %880 = vmatprep.subr.bf16.mxu1 %v879_v55  ;;  %v191_v10 = vld [vmem:[%s1680_s4 + $0x4a0] sm:$0xff]  ;;  %v193_v11 = vld [vmem:[%s1680_s4 + $0x4b0] sm:$0xff]  ;;  %v885_v12 = vpack.c.bf16 %v213_v5, %v211_v4  ;;  %v28_v13 = vld [vmem:[%s1679_s3 + $0x8] sm:$0xff]  ;;  %v887_v15 = vpack.c.bf16 %v218_v8, %v216_v7  ;;  %v659_v8 = vlaneseq }
  0x52   :  { %842 = vmatpush1.bf16.msra.mxu0 %v841_v58  ;;  %v30_v14 = vld [vmem:[%s1679_s3 + $0x18] sm:$0xff]  ;;  %v215_v16 = vld [vmem:[%s1681_s5 + $0xa0] sm:$0xff]  ;;  %v217_v17 = vld [vmem:[%s1681_s5 + $0xb0] sm:$0xff]  ;;  %v849_v18 = vpack.c.bf16 %v193_v11, %v191_v10 }
  0x53   :  { %844 = vmatprep.subr.bf16.mxu0 %v843_v61  ;;  %v220_v19 = vld [vmem:[%s1681_s5 + $0xc8] sm:$0xff]  ;;  %v222_v20 = vld [vmem:[%s1681_s5 + $0xd8] sm:$0xff]  ;;  %v851_v21 = vpack.c.bf16 %v30_v14, %v28_v13  ;;  %v27_v22 = vld [vmem:[%s1679_s3] sm:$0xff]  ;;  %v889_v24 = vpack.c.bf16 %v217_v17, %v215_v16 }
  0x54   :  { %882 = vmatpush1.bf16.msra.mxu1 %v881_v0  ;;  %v29_v23 = vld [vmem:[%s1679_s3 + $0x10] sm:$0xff]  ;;  %v32_v25 = vld [vmem:[%s1679_s3 + $0x28] sm:$0xff]  ;;  %v34_v26 = vld [vmem:[%s1679_s3 + $0x38] sm:$0xff]  ;;  %v891_v27 = vpack.c.bf16 %v222_v20, %v220_v19 }
  0x55   :  { %884 = vmatprep.subr.bf16.mxu1 %v883_v3  ;;  %v219_v28 = vld [vmem:[%s1681_s5 + $0xc0] sm:$0xff]  ;;  %v221_v29 = vld [vmem:[%s1681_s5 + $0xd0] sm:$0xff]  ;;  %v853_v31 = vpack.c.bf16 %v29_v23, %v27_v22  ;;  %v224_v32 = vld [vmem:[%s1681_s5 + $0xe8] sm:$0xff]  ;;  %v855_v34 = vpack.c.bf16 %v34_v26, %v32_v25 }
  0x56   :  { %846 = vmatpush1.bf16.msra.mxu0 %v845_v6  ;;  %v237_v30 = vld [vmem:[%s1677_s1 + $0x20] sm:$0xff]  ;;  %v226_v33 = vld [vmem:[%s1681_s5 + $0xf8] sm:$0xff]  ;;  %v33_v36 = vld [vmem:[%s1679_s3 + $0x30] sm:$0xff]  ;;  %v893_v37 = vpack.c.bf16 %v221_v29, %v219_v28 }
  0x57   :  { %848 = vmatprep.subr.bf16.mxu0 %v847_v9  ;;  %v31_v35 = vld [vmem:[%s1679_s3 + $0x20] sm:$0xff]  ;;  %v36_v38 = vld [vmem:[%s1679_s3 + $0x48] sm:$0xff]  ;;  %v38_v39 = vld [vmem:[%s1679_s3 + $0x58] sm:$0xff]  ;;  %v895_v40 = vpack.c.bf16 %v226_v33, %v224_v32  ;;  %v660_v9 = vshrl.u32 %v659_v8, 7 }
  0x58   :  { %886 = vmatpush1.bf16.msra.mxu1 %v885_v12  ;;  %v223_v41 = vld [vmem:[%s1681_s5 + $0xe0] sm:$0xff]  ;;  %v225_v42 = vld [vmem:[%s1681_s5 + $0xf0] sm:$0xff]  ;;  %v857_v43 = vpack.c.bf16 %v33_v36, %v31_v35  ;;  %v242_v44 = vld [vmem:[%s1677_s1 + $0x48] sm:$0xff]  ;;  %v859_v47 = vpack.c.bf16 %v38_v39, %v36_v38 }
  0x59   :  { %888 = vmatprep.subr.bf16.mxu1 %v887_v15  ;;  %v228_v45 = vld [vmem:[%s1681_s5 + $0x108] sm:$0xff]  ;;  %v230_v46 = vld [vmem:[%s1681_s5 + $0x118] sm:$0xff]  ;;  %v35_v49 = vld [vmem:[%s1679_s3 + $0x40] sm:$0xff]  ;;  %v897_v51 = vpack.c.bf16 %v225_v42, %v223_v41  ;;  %v661_v10 = vsub.s32 0, %v660_v9  ;;  %v665_v13 = vsub.s32 1, %v660_v9 }
  0x5a   :  { %850 = vmatpush1.bf16.msra.mxu0 %v849_v18  ;;  %v37_v50 = vld [vmem:[%s1679_s3 + $0x50] sm:$0xff]  ;;  %v40_v52 = vld [vmem:[%s1679_s3 + $0x68] sm:$0xff]  ;;  %v42_v53 = vld [vmem:[%s1679_s3 + $0x78] sm:$0xff]  ;;  %v899_v54 = vpack.c.bf16 %v230_v46, %v228_v45 }
  0x5b   :  { %852 = vmatprep.subr.bf16.mxu0 %v851_v21  ;;  %v227_v55 = vld [vmem:[%s1681_s5 + $0x100] sm:$0xff]  ;;  %v229_v56 = vld [vmem:[%s1681_s5 + $0x110] sm:$0xff]  ;;  %v861_v57 = vpack.c.bf16 %v37_v50, %v35_v49  ;;  %v863_v58 = vpack.c.bf16 %v42_v53, %v40_v52  ;;  %v568_v0 = vld [vmem:[%s1678_s2 + $0x18] sm:$0xff] }
  0x5c   :  { %890 = vmatpush1.bf16.msra.mxu1 %v889_v24  ;;  %v39_v59 = vld [vmem:[%s1679_s3 + $0x60] sm:$0xff]  ;;  %v41_v60 = vld [vmem:[%s1679_s3 + $0x70] sm:$0xff]  ;;  %v901_v61 = vpack.c.bf16 %v229_v56, %v227_v55  ;;  %v232_v3 = vld [vmem:[%s1676_s0 + $0x8] sm:$0xff] }
  0x5d   :  { %693 = vmatmul.mubr.msk.f32.vlgmr.msra.gmra.mrb[0].mxu0 %vm243_vm1, %v237_v30  ;;  %892 = vmatprep.subr.bf16.mxu1 %v891_v27  ;;  %v865_v62 = vpack.c.bf16 %v41_v60, %v39_v59  ;;  %v565_v63 = vld [vmem:[%s1678_s2] sm:$0xff]  ;;  %v567_v2 = vld [vmem:[%s1678_s2 + $0x10] sm:$0xff] }
  0x5e   :  { %854 = vmatpush1.bf16.msra.mxu0 %v853_v31  ;;  %474 = vmatprep.mubr.f32.mxu0 %v947_v48  ;;  %v231_v1 = vld [vmem:[%s1676_s0] sm:$0xff]  ;;  %s948_s0 = smov [#allocation2]  }
  0x5f   :  { %856 = vmatprep.subr.bf16.mxu0 %v855_v34  ;;  %v657_v12 = vld [vmem:[%s1682_s6] sm:$0x3]  ;;  %s682_s2 = sshll.u32 %s948_s0, 4  ;;  %s683_s2 = int_to_ptr.vmem [resolvable:$true] %s682_s2 }
  0x60   :  { %894 = vmatpush1.bf16.msra.mxu1 %v893_v37  ;;  %v662_v17 = vrot.slane %v657_v12, %v661_v10  ;;  %v666_v19 = vrot.slane %v657_v12, %v665_v13  ;;  %s923_s6 = scalar_lea.vmem %s683_s2, 512  ;;  %p928_p1 = scmp.lt.s32.totalorder %s683_s2, %s683_s2 }
  0x61   :  { %896 = vmatprep.subr.bf16.mxu1 %v895_v40  ;;  %694 = vmatmul.mubr.msk.f32.gmra.mrb[2].mxu0 %vm243_vm1, %v242_v44  ;;  %p924_p0 = scmp.ne.s32.totalorder %s683_s2, %s923_s6  ;;  %p929_p2 = scmp.lt.s32.totalorder %s923_s6, %s923_s6 }
  0x62   :  { %858 = vmatpush1.bf16.msra.mxu0 %v857_v43  ;;  %552 = vmatprep.mubr.f32.mxu0 %v947_v48 }
  0x63   :  { %860 = vmatprep.subr.bf16.mxu0 %v859_v47  ;;  %p930_p3 = por %p929_p2, %p928_p1 }
  0x64   :  { %898 = vmatpush1.bf16.msra.mxu1 %v897_v51 }
  0x65   :  { %900 = vmatprep.subr.bf16.mxu1 %v899_v54  ;;  %p931_p4 = pnand %p930_p3, %p924_p0 }
  0x66   :  { %862 = vmatpush1.bf16.msra.mxu0 %v861_v57 }
  0x67   :  { %864 = vmatprep.subr.bf16.mxu0 %v863_v58 }
  0x68   :  { %902 = vmatpush1.bf16.msra.mxu1 %v901_v61 }
  0x6a   :  { %866 = vmatpush1.bf16.msra.mxu0 %v865_v62 }
  0x6b   :  { %641 = vmatmul.mubr.f32.vlgmr.msra.gmra.mrb[4].mxu1 %v565_v63 }
  0x6c   :  { %698 = vmatprep.mubr.msk.f32.mxu1 %vm569_vm0, %v568_v0 }
  0x6d   :  { %695 = vmatmul.mubr.msk.f32.vlgmr.msra.gmra.mrb[0].mxu0 %vm481_vm2, %v231_v1 }
  0x6e   :  { %558 = vmatprep.mubr.f32.mxu0 %v947_v48 }
  0x6f   :  { %647 = vmatmul.mubr.f32.gmra.mrb[6].mxu1 %v567_v2 }
  0x71   :  { %696 = vmatmul.mubr.msk.f32.gmra.mrb[2].mxu0 %vm481_vm2, %v232_v3 }
 0x11a   :  { %v316_v4 = vpop.f32.mrb[0].mxu1 }
 0x11b   :  { %v318_v5 = vpop.f32.mrb[1].mxu1 }
 0x11e   :  { %v322_v6 = vpop.f32.mrb[2].mxu1 }
 0x11f   :  { %v324_v7 = vpop.f32.mrb[3].mxu1 }
 0x13e   :  { %v642_v11 = vpop.f32.mrb[4].mxu1 }
 0x13f   :  { %v644_v48 = vpop.f32.mrb[5].mxu1 }
 0x140   :  { %v554_v14 = vpop.f32.mrb[0].mxu0 }
 0x141   :  { %v903_v15 = vadd.f32 %v554_v14, %v316_v4  ;;  %v556_v16 = vpop.f32.mrb[1].mxu0 }
 0x142   :  { %v905_v18 = vadd.f32 %v556_v16, %v318_v5  ;;  %v648_v20 = vpop.f32.mrb[6].mxu1 }
 0x143   :  { %v904_v21 = vadd.f32 %v903_v15, %v642_v11  ;;  %v650_v22 = vpop.f32.mrb[7].mxu1 }
 0x144   :  { %v906_v23 = vadd.f32 %v905_v18, %v644_v48  ;;  %v560_v24 = vpop.f32.mrb[2].mxu0 }
 0x145   :  { %v669_v25 = vadd.f32 %v904_v21, %v662_v17  ;;  %v907_v26 = vadd.f32 %v560_v24, %v322_v6  ;;  %v562_v27 = vpop.f32.mrb[3].mxu0 }
 0x146   :  { %v670_v28 = vadd.f32 %v906_v23, %v666_v19  ;;  %v909_v29 = vadd.f32 %v562_v27, %v324_v7 }
 0x147   :  { %673 = vst [vmem:[#allocation2] sm:$0xff] %v669_v25  ;;  %v908_v30 = vadd.f32 %v907_v26, %v648_v20 }
 0x148   :  { %674 = vst.msk [vmem:[#allocation2 + $0x8] sm:$0xff] %vm569_vm0, %v670_v28  ;;  %v910_v31 = vadd.f32 %v909_v29, %v650_v22 }
 0x149   :  { %v671_v32 = vadd.f32 %v908_v30, %v662_v17 }
 0x14a   :  { %v672_v33 = vadd.f32 %v910_v31, %v666_v19 }
 0x14b   :  { %675 = vst [vmem:[#allocation2 + $0x10] sm:$0xff] %v671_v32 }
 0x14c   :  { %676 = vst.msk [vmem:[#allocation2 + $0x18] sm:$0xff] %vm569_vm0, %v672_v33 }
 0x14d   :  { %934 = shalt.err (!%p931_p4)
}
 0x14e   :  { %s935_s25 = scalar_lea.hbm %s1683_s7, 512 }
 0x14f   :  { %p936_p5 = scmp.ne.s32.totalorder %s1683_s7, %s935_s25  ;;  %p939_p6 = scmp.lt.u32.totalorder %s935_s25, %s1683_s7 }
 0x151   :  { %p941_p7 = pnand %p939_p6, %p936_p5 }
 0x153   :  { %944 = shalt.err (!%p941_p7)
}
 0x154   :  { %s949_s29 = smov 256   ;;  %s950_s4 = smov 16  }
 0x155   :  { %688 = dma.vmem_to_hbm [thread:$0]  %s683_s2, 512, %s1683_s7, [#allocation3], %s949_s29, %s949_s29, %s950_s4  }
 0x156   :  { %945 = dma.done.wait [#allocation3], 512  }
 0x157   :  { %946 = vsyncadd [#allocation3], 4294966784 }
 0x158   :  { %692 = vsyncpa [#allocation3], 1 }

</bundles_post_ra>
